<compile_context>
chip_gen: v6e
topology: v6e:2x2x1
jax: 0.10.0
libtpu: 0.0.40
codegen_flags: <defaults>
</compile_context>

<pallas_src>
import functools

import jax
import jax.numpy as jnp
from jax.experimental import pallas as pl
from jax.experimental.pallas import tpu as pltpu

LANE = 128
SUBLANE = 8


def _round_up(x, m):
    return ((x + m - 1) // m) * m


# --------------------------------------------------------------------------- #
# Kernel
# --------------------------------------------------------------------------- #
def lossval_mlp_kernel(x_ref, w_in_ref, b_in_ref, w_hid_ref, b_hid_ref,
                       w_out_ref, b_out_ref, o_ref, *, num_hidden,
                       is_classification, unroll_hidden):
    """One batch tile of the full MLP.

    Matmul operands may be bf16; accumulation, bias, ReLU and softmax are f32.
    The hidden dim is zero-padded to a lane multiple (exact for the algebra);
    D_in and D_out are left un-padded.
    """
    # TODO(synk): custom act_fn from the torch module has no counterpart here;
    # the default nn.ReLU is assumed.
    mm_dtype = w_in_ref.dtype

    # Input layer: Linear + ReLU.  The x cast runs on the VPU and hides under
    # the MXU matmul (no wrapper-side HBM cast pass).
    x = x_ref[...].astype(mm_dtype)
    h = jnp.dot(x, w_in_ref[...], preferred_element_type=jnp.float32)
    h = jnp.maximum(h + b_in_ref[...], 0.0)

    def hidden_layer(i, h):
        z = jnp.dot(h.astype(mm_dtype), w_hid_ref[i],
                    preferred_element_type=jnp.float32)
        return jnp.maximum(z + b_hid_ref[i], 0.0)

    if unroll_hidden:
        for i in range(num_hidden):          # small static unroll
            h = hidden_layer(i, h)
    else:
        # Deep MLP: bound code size / vreg live ranges with a real loop.
        h = jax.lax.fori_loop(0, num_hidden, hidden_layer, h)

    # Output layer: Linear (+ Softmax(-1) if classification).  D_out is
    # un-padded, so no column masking is needed inside the softmax.
    out = jnp.dot(h.astype(mm_dtype), w_out_ref[...],
                  preferred_element_type=jnp.float32)
    out = out + b_out_ref[...]

    if is_classification:
        m = jnp.max(out, axis=-1, keepdims=True)
        e = jnp.exp(out - m)
        s = jnp.sum(e, axis=-1, keepdims=True)
        # EUP approx reciprocal (~1e-3..1e-4 rel. error): rows sum to 1 only
        # approximately; acceptable for this model's softmax head.
        out = e * pl.reciprocal(s, approx=True)

    o_ref[...] = out.astype(o_ref.dtype)


# --------------------------------------------------------------------------- #
# One-time parameter preparation (outside the per-call path)
# --------------------------------------------------------------------------- #
def prepare_params(params, matmul_dtype=jnp.bfloat16):
    """Zero-pads the hidden dim to a lane multiple and casts weights to the
    matmul operand dtype ONCE.  Biases stay f32 (bias/ReLU/softmax math is
    f32).  Zero padding is exact: padded columns produce relu(0)=0 activations
    that contribute nothing downstream."""
    w_in, b_in, w_hid, b_hid, w_out, b_out = params
    D_in, H = w_in.shape
    D_out = w_out.shape[1]
    num_hidden = w_hid.shape[0]
    H_p = _round_up(H, LANE)
    mm = jnp.dtype(matmul_dtype)

    def pad_to(a, shape):
        return jnp.pad(a, [(0, t - s) for s, t in zip(a.shape, shape)])

    w_in_p = pad_to(w_in, (D_in, H_p)).astype(mm)
    b_in_p = pad_to(b_in, (1, H_p)).astype(jnp.float32)
    w_hid_p = pad_to(w_hid, (num_hidden, H_p, H_p)).astype(mm)
    b_hid_p = pad_to(b_hid, (num_hidden, 1, H_p)).astype(jnp.float32)
    w_out_p = pad_to(w_out, (H_p, D_out)).astype(mm)
    b_out_p = b_out.astype(jnp.float32)
    return w_in_p, b_in_p, w_hid_p, b_hid_p, w_out_p, b_out_p


# --------------------------------------------------------------------------- #
# Forward wrapper
# --------------------------------------------------------------------------- #
def lossval_mlp_forward(x, prepared_params, *, is_classification,
                        batch_tile=None):
    """Full MLP forward in a single Pallas kernel, tiled over the batch.

    `x` is passed un-padded and un-cast (f32 in HBM); `prepared_params` come
    from prepare_params() and are already padded / cast (one-time cost)."""
    w_in, b_in, w_hid, b_hid, w_out, b_out = prepared_params
    B, D_in = x.shape
    assert w_in.shape[0] == D_in, "x / W_in dim mismatch"
    H_p = w_in.shape[1]
    D_out = w_out.shape[1]
    num_hidden = w_hid.shape[0]
    mm_bytes = jnp.dtype(w_in.dtype).itemsize

    # ---- generation-aware VMEM budget --------------------------------------
    try:
        phys_vmem = int(pltpu.get_tpu_info().vmem_capacity_bytes)
    except Exception:
        phys_vmem = 64 * 1024 * 1024            # conservative (v7x per-TC size)
    vmem_cap = phys_vmem * 3 // 4               # headroom for compiler scratch

    # Weights are resident once (constant index_map + Buffered(1)).
    weight_bytes = ((D_in * H_p + num_hidden * H_p * H_p + H_p * D_out) * mm_bytes
                    + ((num_hidden + 1) * H_p + D_out) * 4)
    # Per-row VMEM: double-buffered x & out tiles + a few f32 activation copies.
    row_bytes = 2 * D_in * 4 + 2 * D_out * 4 + 4 * H_p * 4

    # ---- batch tile: VMEM-driven cap, >= 2 grid steps when B > 8 -----------
    if batch_tile is None:
        avail = max(vmem_cap - weight_bytes - (4 << 20), SUBLANE * row_bytes)
        tb_cap = max(SUBLANE,
                     min(2048, (avail // row_bytes) // SUBLANE * SUBLANE))
        if B > SUBLANE:
            tb = min(tb_cap, _round_up(pl.cdiv(B, 2), SUBLANE))
        else:
            tb = SUBLANE
    else:
        tb = max(SUBLANE, _round_up(batch_tile, SUBLANE))
    grid_b = pl.cdiv(B, tb)

    io_bytes = 2 * tb * D_in * 4 + 2 * tb * D_out * 4
    act_bytes = 4 * tb * H_p * 4
    need = weight_bytes + io_bytes + act_bytes
    vmem_limit = min(vmem_cap, max(32 << 20, int(1.5 * need) + (4 << 20)))

    # TODO(synk): if `need` approaches ~40 MiB (v7x has 64 MiB per TC), stream
    # W_hid instead of keeping it resident: memory_space=pl.ANY + a 2-deep
    # (H_p, H_p) slab double-buffered with pltpu.make_async_copy so layer i+1's
    # weight DMA overlaps layer i's matmul.

    flops = 2 * B * (D_in * H_p + num_hidden * H_p * H_p + H_p * D_out)
    transcendentals = B * D_out if is_classification else 0
    bytes_accessed = B * D_in * 4 + weight_bytes + B * D_out * 4
    cost = pl.CostEstimate(flops=flops, transcendentals=transcendentals,
                           bytes_accessed=bytes_accessed)

    kernel = functools.partial(
        lossval_mlp_kernel,
        num_hidden=num_hidden,
        is_classification=is_classification,
        unroll_hidden=num_hidden <= 8,
    )

    # Constant-index weights/biases: one VMEM copy, no double buffering.
    single_buf = pl.Buffered(1)
    # TODO(synk): on v5e, if xprof shows exposed x-tile DMA, switch the x spec
    # to pipeline_mode=pl.Buffered(3) (costs one extra tb*D_in*4-byte buffer).

    out = pl.pallas_call(
        kernel,
        out_shape=jax.ShapeDtypeStruct((B, D_out), jnp.float32),
        grid_spec=pltpu.PrefetchScalarGridSpec(
            num_scalar_prefetch=0,
            grid=(grid_b,),
            in_specs=[
                pl.BlockSpec((tb, D_in), lambda i: (i, 0)),                   # x tile
                pl.BlockSpec((D_in, H_p), lambda i: (0, 0),
                             pipeline_mode=single_buf),                       # W_in
                pl.BlockSpec((1, H_p), lambda i: (0, 0),
                             pipeline_mode=single_buf),                       # b_in
                pl.BlockSpec((num_hidden, H_p, H_p), lambda i: (0, 0, 0),
                             pipeline_mode=single_buf),                       # W_hid
                pl.BlockSpec((num_hidden, 1, H_p), lambda i: (0, 0, 0),
                             pipeline_mode=single_buf),                       # b_hid
                pl.BlockSpec((H_p, D_out), lambda i: (0, 0),
                             pipeline_mode=single_buf),                       # W_out
                pl.BlockSpec((1, D_out), lambda i: (0, 0),
                             pipeline_mode=single_buf),                       # b_out
            ],
            out_specs=pl.BlockSpec((tb, D_out), lambda i: (i, 0)),            # un-padded
        ),
        compiler_params=pltpu.CompilerParams(
            # TODO(synk): on v7x verify "parallel" shards the batch axis across
            # both TensorCores; switch to pltpu.CORE_PARALLEL if one TC idles.
            dimension_semantics=("parallel",),
            vmem_limit_bytes=vmem_limit),
        cost_estimate=cost,
    )(x, w_in, b_in, w_hid, b_hid, w_out, b_out)

    return out


# --------------------------------------------------------------------------- #
# Init + pure-JAX reference
# --------------------------------------------------------------------------- #
def init_params(key, input_dim, hidden_dim, output_dim, layers):
    """Deterministic init mirroring torch.nn.Linear's U(-1/sqrt(fan_in), +).
    Weights are stored (in_features, out_features); biases (1, out_features)."""
    num_hidden = layers - 2
    assert num_hidden >= 1, "layers >= 3 assumed (same as the torch module)"
    keys = jax.random.split(key, 2 * (num_hidden + 2))

    def linear(kw, kb, fan_in, fan_out):
        bound = fan_in ** -0.5
        w = jax.random.uniform(kw, (fan_in, fan_out), jnp.float32, -bound, bound)
        b = jax.random.uniform(kb, (1, fan_out), jnp.float32, -bound, bound)
        return w, b

    w_in, b_in = linear(keys[0], keys[1], input_dim, hidden_dim)

    w_hid_list, b_hid_list = [], []
    for i in range(num_hidden):
        w, b = linear(keys[2 + 2 * i], keys[3 + 2 * i], hidden_dim, hidden_dim)
        w_hid_list.append(w)
        b_hid_list.append(b)
    w_hid = jnp.stack(w_hid_list, axis=0)                 # (num_hidden, H, H)
    b_hid = jnp.stack(b_hid_list, axis=0)                 # (num_hidden, 1, H)

    w_out, b_out = linear(keys[-2], keys[-1], hidden_dim, output_dim)
    return w_in, b_in, w_hid, b_hid, w_out, b_out


def reference_forward(x, params, *, is_classification):
    """Pure-JAX reference of the same forward (sanity check)."""
    w_in, b_in, w_hid, b_hid, w_out, b_out = params
    h = jnp.maximum(x @ w_in + b_in, 0.0)
    for i in range(w_hid.shape[0]):
        h = jnp.maximum(h @ w_hid[i] + b_hid[i], 0.0)
    out = h @ w_out + b_out
    if is_classification:
        out = jax.nn.softmax(out, axis=-1)
    return out


if __name__ == "__main__":
    # Small shapes consistent with the module: batch=8, input_dim=16,
    # hidden_dim=32, output_dim=8, layers=5 (=> 3 hidden Linear+ReLU blocks).
    BATCH = 8
    INPUT_DIM = 16
    HIDDEN_DIM = 32
    OUTPUT_DIM = 8
    LAYERS = 5

    key = jax.random.PRNGKey(0)
    k_x, k_p, k_x2 = jax.random.split(key, 3)

    x = jax.random.normal(k_x, (BATCH, INPUT_DIM), dtype=jnp.float32)
    params = init_params(k_p, INPUT_DIM, HIDDEN_DIM, OUTPUT_DIM, LAYERS)

    ref_cls = reference_forward(x, params, is_classification=True)
    ref_reg = reference_forward(x, params, is_classification=False)

    # f32-operand path: classification (softmax head) and regression heads.
    p_f32 = prepare_params(params, matmul_dtype=jnp.float32)
    out_cls = jax.block_until_ready(
        lossval_mlp_forward(x, p_f32, is_classification=True))
    assert out_cls.shape == (BATCH, OUTPUT_DIM)
    assert jnp.allclose(out_cls, ref_cls, atol=5e-3, rtol=5e-3), "softmax path mismatch"

    out_reg = jax.block_until_ready(
        lossval_mlp_forward(x, p_f32, is_classification=False))
    assert out_reg.shape == (BATCH, OUTPUT_DIM)
    assert jnp.allclose(out_reg, ref_reg, atol=1e-3, rtol=1e-3), "regression path mismatch"

    # Default bf16-operand path (f32 accumulation) on a batch that is NOT a
    # multiple of the tile: exercises the multi-step grid + partial last block.
    BATCH2 = 20
    x2 = jax.random.normal(k_x2, (BATCH2, INPUT_DIM), dtype=jnp.float32)
    ref2 = reference_forward(x2, params, is_classification=True)
    p_bf16 = prepare_params(params)                        # default bfloat16
    out2 = jax.block_until_ready(
        lossval_mlp_forward(x2, p_bf16, is_classification=True))
    assert out2.shape == (BATCH2, OUTPUT_DIM)
    assert bool(jnp.all(jnp.isfinite(out2)))
    assert jnp.allclose(out2, ref2, atol=5e-2, rtol=5e-2), "bf16 path mismatch"

    print("KERNEL_OK")
</pallas_src>

<mosaic_0001>
module attributes {stable_mosaic.version = 11 : i64} {
  func.func @lossval_mlp_kernel(%arg0: i32, %arg1: memref<8x16xf32, #tpu.memory_space<vmem>>, %arg2: memref<16x128xf32, #tpu.memory_space<vmem>>, %arg3: memref<1x128xf32, #tpu.memory_space<vmem>>, %arg4: memref<3x128x128xf32, #tpu.memory_space<vmem>>, %arg5: memref<3x1x128xf32, #tpu.memory_space<vmem>>, %arg6: memref<128x8xf32, #tpu.memory_space<vmem>>, %arg7: memref<1x8xf32, #tpu.memory_space<vmem>>, %arg8: memref<8x8xf32, #tpu.memory_space<vmem>>) attributes {dimension_semantics = [#tpu.dimension_semantics<parallel>], iteration_bounds = array<i64: 1>, scalar_prefetch = 0 : i64, scratch_operands = 0 : i64, tpu.core_type = #tpu.core_type<tc>, window_params = [{transform_indices = @transform_0, window_bounds = array<i64: 8, 16>}, {pipeline_mode = #tpu.pipeline_mode<synchronous>, transform_indices = @transform_1, window_bounds = array<i64: 16, 128>}, {pipeline_mode = #tpu.pipeline_mode<synchronous>, transform_indices = @transform_2, window_bounds = array<i64: 1, 128>}, {pipeline_mode = #tpu.pipeline_mode<synchronous>, transform_indices = @transform_3, window_bounds = array<i64: 3, 128, 128>}, {pipeline_mode = #tpu.pipeline_mode<synchronous>, transform_indices = @transform_4, window_bounds = array<i64: 3, 1, 128>}, {pipeline_mode = #tpu.pipeline_mode<synchronous>, transform_indices = @transform_5, window_bounds = array<i64: 128, 8>}, {pipeline_mode = #tpu.pipeline_mode<synchronous>, transform_indices = @transform_6, window_bounds = array<i64: 1, 8>}, {transform_indices = @transform_7, window_bounds = array<i64: 8, 8>}]} {
    %c0 = arith.constant 0 : index
    %c0_0 = arith.constant 0 : index
    %0 = vector.load %arg1[%c0, %c0_0] : memref<8x16xf32, #tpu.memory_space<vmem>>, vector<8x16xf32>
    %c0_1 = arith.constant 0 : index
    %c0_2 = arith.constant 0 : index
    %1 = vector.load %arg2[%c0_1, %c0_2] : memref<16x128xf32, #tpu.memory_space<vmem>>, vector<16x128xf32>
    %cst = arith.constant dense<0.000000e+00> : vector<8x128xf32>
    %2 = tpu.matmul %0, %1, %cst {dimension_numbers = #tpu.dot_dimension_numbers<[1], [0], [0], [1], [0, 0, 1, 1], [], []>} : vector<8x16xf32>, vector<16x128xf32>, vector<8x128xf32> -> vector<8x128xf32>
    %c0_3 = arith.constant 0 : index
    %c0_4 = arith.constant 0 : index
    %3 = vector.load %arg3[%c0_3, %c0_4] : memref<1x128xf32, #tpu.memory_space<vmem>>, vector<1x128xf32>
    %4 = vector.broadcast %3 : vector<1x128xf32> to vector<8x128xf32>
    %5 = arith.addf %2, %4 : vector<8x128xf32>
    %cst_5 = arith.constant 0.000000e+00 : f32
    %6 = vector.broadcast %cst_5 : f32 to vector<8x128xf32>
    %7 = arith.maximumf %5, %6 : vector<8x128xf32>
    %c0_6 = arith.constant 0 : index
    %c0_7 = arith.constant 0 : index
    %c0_8 = arith.constant 0 : index
    %8 = vector.load %arg4[%c0_6, %c0_7, %c0_8] : memref<3x128x128xf32, #tpu.memory_space<vmem>>, vector<1x128x128xf32>
    %9 = vector.shape_cast %8 : vector<1x128x128xf32> to vector<128x128xf32>
    %cst_9 = arith.constant dense<0.000000e+00> : vector<8x128xf32>
    %10 = tpu.matmul %7, %9, %cst_9 {dimension_numbers = #tpu.dot_dimension_numbers<[1], [0], [0], [1], [0, 0, 1, 1], [], []>} : vector<8x128xf32>, vector<128x128xf32>, vector<8x128xf32> -> vector<8x128xf32>
    %c0_10 = arith.constant 0 : index
    %c0_11 = arith.constant 0 : index
    %c0_12 = arith.constant 0 : index
    %11 = vector.load %arg5[%c0_10, %c0_11, %c0_12] : memref<3x1x128xf32, #tpu.memory_space<vmem>>, vector<1x1x128xf32>
    %12 = vector.shape_cast %11 : vector<1x1x128xf32> to vector<1x128xf32>
    %13 = vector.broadcast %12 : vector<1x128xf32> to vector<8x128xf32>
    %14 = arith.addf %10, %13 : vector<8x128xf32>
    %cst_13 = arith.constant 0.000000e+00 : f32
    %15 = vector.broadcast %cst_13 : f32 to vector<8x128xf32>
    %16 = arith.maximumf %14, %15 : vector<8x128xf32>
    %c1 = arith.constant 1 : index
    %c0_14 = arith.constant 0 : index
    %c0_15 = arith.constant 0 : index
    %17 = vector.load %arg4[%c1, %c0_14, %c0_15] : memref<3x128x128xf32, #tpu.memory_space<vmem>>, vector<1x128x128xf32>
    %18 = vector.shape_cast %17 : vector<1x128x128xf32> to vector<128x128xf32>
    %cst_16 = arith.constant dense<0.000000e+00> : vector<8x128xf32>
    %19 = tpu.matmul %16, %18, %cst_16 {dimension_numbers = #tpu.dot_dimension_numbers<[1], [0], [0], [1], [0, 0, 1, 1], [], []>} : vector<8x128xf32>, vector<128x128xf32>, vector<8x128xf32> -> vector<8x128xf32>
    %c1_17 = arith.constant 1 : index
    %c0_18 = arith.constant 0 : index
    %c0_19 = arith.constant 0 : index
    %20 = vector.load %arg5[%c1_17, %c0_18, %c0_19] : memref<3x1x128xf32, #tpu.memory_space<vmem>>, vector<1x1x128xf32>
    %21 = vector.shape_cast %20 : vector<1x1x128xf32> to vector<1x128xf32>
    %22 = vector.broadcast %21 : vector<1x128xf32> to vector<8x128xf32>
    %23 = arith.addf %19, %22 : vector<8x128xf32>
    %cst_20 = arith.constant 0.000000e+00 : f32
    %24 = vector.broadcast %cst_20 : f32 to vector<8x128xf32>
    %25 = arith.maximumf %23, %24 : vector<8x128xf32>
    %c2 = arith.constant 2 : index
    %c0_21 = arith.constant 0 : index
    %c0_22 = arith.constant 0 : index
    %26 = vector.load %arg4[%c2, %c0_21, %c0_22] : memref<3x128x128xf32, #tpu.memory_space<vmem>>, vector<1x128x128xf32>
    %27 = vector.shape_cast %26 : vector<1x128x128xf32> to vector<128x128xf32>
    %cst_23 = arith.constant dense<0.000000e+00> : vector<8x128xf32>
    %28 = tpu.matmul %25, %27, %cst_23 {dimension_numbers = #tpu.dot_dimension_numbers<[1], [0], [0], [1], [0, 0, 1, 1], [], []>} : vector<8x128xf32>, vector<128x128xf32>, vector<8x128xf32> -> vector<8x128xf32>
    %c2_24 = arith.constant 2 : index
    %c0_25 = arith.constant 0 : index
    %c0_26 = arith.constant 0 : index
    %29 = vector.load %arg5[%c2_24, %c0_25, %c0_26] : memref<3x1x128xf32, #tpu.memory_space<vmem>>, vector<1x1x128xf32>
    %30 = vector.shape_cast %29 : vector<1x1x128xf32> to vector<1x128xf32>
    %31 = vector.broadcast %30 : vector<1x128xf32> to vector<8x128xf32>
    %32 = arith.addf %28, %31 : vector<8x128xf32>
    %cst_27 = arith.constant 0.000000e+00 : f32
    %33 = vector.broadcast %cst_27 : f32 to vector<8x128xf32>
    %34 = arith.maximumf %32, %33 : vector<8x128xf32>
    %c0_28 = arith.constant 0 : index
    %c0_29 = arith.constant 0 : index
    %35 = vector.load %arg6[%c0_28, %c0_29] : memref<128x8xf32, #tpu.memory_space<vmem>>, vector<128x8xf32>
    %cst_30 = arith.constant dense<0.000000e+00> : vector<8x8xf32>
    %36 = tpu.matmul %34, %35, %cst_30 {dimension_numbers = #tpu.dot_dimension_numbers<[1], [0], [0], [1], [0, 0, 1, 1], [], []>} : vector<8x128xf32>, vector<128x8xf32>, vector<8x8xf32> -> vector<8x8xf32>
    %c0_31 = arith.constant 0 : index
    %c0_32 = arith.constant 0 : index
    %37 = vector.load %arg7[%c0_31, %c0_32] : memref<1x8xf32, #tpu.memory_space<vmem>>, vector<1x8xf32>
    %38 = vector.broadcast %37 : vector<1x8xf32> to vector<8x8xf32>
    %39 = arith.addf %36, %38 : vector<8x8xf32>
    %cst_33 = arith.constant dense<0xFF800000> : vector<8xf32>
    %40 = vector.multi_reduction <maximumf>, %39, %cst_33 [1] : vector<8x8xf32> to vector<8xf32>
    %41 = vector.shape_cast %40 : vector<8xf32> to vector<8x1xf32>
    %42 = vector.broadcast %41 : vector<8x1xf32> to vector<8x8xf32>
    %43 = arith.subf %39, %42 : vector<8x8xf32>
    %44 = math.exp %43 : vector<8x8xf32>
    %cst_34 = arith.constant dense<0.000000e+00> : vector<8xf32>
    %45 = vector.multi_reduction <add>, %44, %cst_34 [1] : vector<8x8xf32> to vector<8xf32>
    %46 = vector.shape_cast %45 : vector<8xf32> to vector<8x1xf32>
    %47 = tpu.reciprocal %46 {approx = true} : vector<8x1xf32> -> vector<8x1xf32>
    %48 = vector.broadcast %47 : vector<8x1xf32> to vector<8x8xf32>
    %49 = arith.mulf %44, %48 : vector<8x8xf32>
    %c0_35 = arith.constant 0 : index
    %c0_36 = arith.constant 0 : index
    %50 = vector.load %arg8[%c0_35, %c0_36] : memref<8x8xf32, #tpu.memory_space<vmem>>, vector<8x8xf32>
    tpu.vector_store %arg8[%c0_35, %c0_36], %49 {strides = array<i32>} : memref<8x8xf32, #tpu.memory_space<vmem>>, vector<8x8xf32>,
    return
  }
  func.func @transform_0(%arg0: i32) -> (i32, i32) {
    %c0_i32 = arith.constant 0 : i32
    %c0_i32_0 = arith.constant 0 : i32
    return %arg0, %c0_i32 : i32, i32
  }
  func.func @transform_1(%arg0: i32) -> (i32, i32) {
    %c0_i32 = arith.constant 0 : i32
    %c0_i32_0 = arith.constant 0 : i32
    %c0_i32_1 = arith.constant 0 : i32
    return %c0_i32, %c0_i32_0 : i32, i32
  }
  func.func @transform_2(%arg0: i32) -> (i32, i32) {
    %c0_i32 = arith.constant 0 : i32
    %c0_i32_0 = arith.constant 0 : i32
    %c0_i32_1 = arith.constant 0 : i32
    return %c0_i32, %c0_i32_0 : i32, i32
  }
  func.func @transform_3(%arg0: i32) -> (i32, i32, i32) {
    %c0_i32 = arith.constant 0 : i32
    %c0_i32_0 = arith.constant 0 : i32
    %c0_i32_1 = arith.constant 0 : i32
    %c0_i32_2 = arith.constant 0 : i32
    return %c0_i32, %c0_i32_0, %c0_i32_1 : i32, i32, i32
  }
  func.func @transform_4(%arg0: i32) -> (i32, i32, i32) {
    %c0_i32 = arith.constant 0 : i32
    %c0_i32_0 = arith.constant 0 : i32
    %c0_i32_1 = arith.constant 0 : i32
    %c0_i32_2 = arith.constant 0 : i32
    return %c0_i32, %c0_i32_0, %c0_i32_1 : i32, i32, i32
  }
  func.func @transform_5(%arg0: i32) -> (i32, i32) {
    %c0_i32 = arith.constant 0 : i32
    %c0_i32_0 = arith.constant 0 : i32
    %c0_i32_1 = arith.constant 0 : i32
    return %c0_i32, %c0_i32_0 : i32, i32
  }
  func.func @transform_6(%arg0: i32) -> (i32, i32) {
    %c0_i32 = arith.constant 0 : i32
    %c0_i32_0 = arith.constant 0 : i32
    %c0_i32_1 = arith.constant 0 : i32
    return %c0_i32, %c0_i32_0 : i32, i32
  }
  func.func @transform_7(%arg0: i32) -> (i32, i32) {
    %c0_i32 = arith.constant 0 : i32
    %c0_i32_0 = arith.constant 0 : i32
    return %arg0, %c0_i32 : i32, i32
  }
}

</mosaic_0001>

<bundles_post_ra>
// kernel: tpu_custom_call.1
= control target key start
LH: loop header
LB: loop body
LE: loop exit
PB: predicated region body
PF: predicated region fallthrough
CT: control target
= control target key end

     0   :  { %12 = vsyncpa [#allocation3], 0  ;;  %s1016_s0 = inlined_call_operand.vmem [shape: f32[8,16], index: 0, kind: input, shape index: {}]   ;;  %s1017_s1 = inlined_call_operand.vmem [shape: f32[16,128], index: 1, kind: input, shape index: {}]   ;;  %s1018_s2 = inlined_call_operand.vmem [shape: f32[1,128], index: 2, kind: input, shape index: {}]   ;;  %s1019_s3 = inlined_call_operand.hbm [shape: f32[3,128,128], index: 3, kind: input, shape index: {}]   ;;  %s1020_s4 = inlined_call_operand.vmem [shape: f32[3,1,128], index: 4, kind: input, shape index: {}]   ;;  %s1021_s5 = inlined_call_operand.vmem [shape: f32[128,8], index: 5, kind: input, shape index: {}]   ;;  %s1022_s6 = inlined_call_operand.vmem [shape: f32[1,8], index: 6, kind: input, shape index: {}]   ;;  %s1023_s7 = inlined_call_operand.hbm [shape: f32[8,8], index: 7, kind: output, shape index: {}]  }
   0x1   :  { %13 = vsyncpa [#allocation4], 0  ;;  %s813_s24 = smov [#allocation2]  }
   0x2   :  { %s25_s25 = sshll.u32 %s813_s24, 4  ;;  %s26_s25 = int_to_ptr.vmem [resolvable:$true] %s25_s25 }
   0x3   :  { %s777_s26 = scalar_lea.vmem %s26_s25, 6144  ;;  %p782_p1 = scmp.lt.s32.totalorder %s26_s25, %s26_s25 }
   0x4   :  { %p778_p0 = scmp.ne.s32.totalorder %s26_s25, %s777_s26  ;;  %p783_p2 = scmp.lt.s32.totalorder %s777_s26, %s777_s26 }
   0x6   :  { %p784_p3 = por %p783_p2, %p782_p1 }
   0x8   :  { %p785_p4 = pnand %p784_p3, %p778_p0 }
   0xa   :  { %788 = shalt.err (!%p785_p4)
}
   0xb   :  { %s814_s27 = smov 128   ;;  %s815_s28 = smov 8  }
   0xc   :  { %31 = dma.hbm_to_vmem [thread:$0]  %s1019_s3, 6144, %s26_s25, [#allocation3], %s814_s27, %s814_s27, %s815_s28  }
   0xd   :  { %809 = dma.done.wait [#allocation3], 6144  }
   0xe   :  { %810 = vsyncadd [#allocation3], 4294961152  ;;  %v816_v0 = vmov 0.0   ;;  %vm817_vm0 = vmmov 0   ;;  %v43_v1 = vld [vmem:[%s1017_s1 + $0x8] sm:$0xff]  ;;  %v42_v2 = vld [vmem:[%s1017_s1] sm:$0xff] }
   0xf   :  { %612 = vmatprep.subr.mxu0 %v816_v0  ;;  %616 = vmatprep.mubr.msk.f32.mxu0 %vm817_vm0, %v816_v0  ;;  %v41_v3 = vld [vmem:[%s1016_s0] sm:$0xff]  ;;  %vm51_vm1 = vcmask 130048   ;;  %v141_v4 = vld [vmem:[#allocation2 + $0x78] sm:$0xff]  ;;  %v140_v5 = vld [vmem:[#allocation2 + $0x70] sm:$0xff]  ;;  %vm505_vm2 = vcmask 64512  }
  0x10   :  { %619 = vmatprep.subr.mxu1 %v816_v0  ;;  %651 = vmatprep.mubr.msk.f32.mxu1 %vm817_vm0, %v816_v0  ;;  %v139_v6 = vld [vmem:[#allocation2 + $0x68] sm:$0xff]  ;;  %v138_v7 = vld [vmem:[#allocation2 + $0x60] sm:$0xff]  ;;  %v137_v8 = vld [vmem:[#allocation2 + $0x58] sm:$0xff] }
  0x11   :  { %613 = vmatpush3.msra.mxu0 %v43_v1  ;;  %620 = vmatpush3.msra.mxu1 %v141_v4  ;;  %v136_v9 = vld [vmem:[#allocation2 + $0x50] sm:$0xff]  ;;  %v135_v10 = vld [vmem:[#allocation2 + $0x48] sm:$0xff]  ;;  %v134_v11 = vld [vmem:[#allocation2 + $0x40] sm:$0xff] }
  0x12   :  { %614 = vmatprep.subr.mxu0 %v816_v0  ;;  %621 = vmatprep.subr.mxu1 %v816_v0  ;;  %v133_v12 = vld [vmem:[#allocation2 + $0x38] sm:$0xff]  ;;  %v132_v13 = vld [vmem:[#allocation2 + $0x30] sm:$0xff]  ;;  %v131_v14 = vld [vmem:[#allocation2 + $0x28] sm:$0xff] }
  0x13   :  { %615 = vmatpush3.msra.mxu0 %v42_v2  ;;  %622 = vmatpush3.msra.mxu1 %v140_v5  ;;  %v130_v15 = vld [vmem:[#allocation2 + $0x20] sm:$0xff]  ;;  %v129_v16 = vld [vmem:[#allocation2 + $0x18] sm:$0xff]  ;;  %v128_v17 = vld [vmem:[#allocation2 + $0x10] sm:$0xff] }
  0x14   :  { %617 = vmatmul.mubr.msk.f32.vlgmr.msra.gmra.mxu0 %vm51_vm1, %v41_v3  ;;  %623 = vmatprep.subr.mxu1 %v816_v0  ;;  %v127_v18 = vld [vmem:[#allocation2 + $0x8] sm:$0xff]  ;;  %v126_v19 = vld [vmem:[#allocation2] sm:$0xff]  ;;  %v236_v20 = vld [vmem:[#allocation2 + $0xf8] sm:$0xff] }
  0x15   :  { %654 = vmatprep.subr.mxu0 %v816_v0  ;;  %624 = vmatpush3.msra.mxu1 %v139_v6  ;;  %v235_v21 = vld [vmem:[#allocation2 + $0xf0] sm:$0xff]  ;;  %v234_v22 = vld [vmem:[#allocation2 + $0xe8] sm:$0xff]  ;;  %v233_v23 = vld [vmem:[#allocation2 + $0xe0] sm:$0xff] }
  0x16   :  { %686 = vmatprep.mubr.msk.f32.mxu0 %vm817_vm0, %v816_v0  ;;  %625 = vmatprep.subr.mxu1 %v816_v0  ;;  %v232_v24 = vld [vmem:[#allocation2 + $0xd8] sm:$0xff]  ;;  %v231_v25 = vld [vmem:[#allocation2 + $0xd0] sm:$0xff]  ;;  %v230_v26 = vld [vmem:[#allocation2 + $0xc8] sm:$0xff] }
  0x17   :  { %626 = vmatpush3.msra.mxu1 %v138_v7  ;;  %655 = vmatpush3.msra.mxu0 %v236_v20  ;;  %v229_v27 = vld [vmem:[#allocation2 + $0xc0] sm:$0xff]  ;;  %v228_v28 = vld [vmem:[#allocation2 + $0xb8] sm:$0xff]  ;;  %v227_v29 = vld [vmem:[#allocation2 + $0xb0] sm:$0xff] }
  0x18   :  { %627 = vmatprep.subr.mxu1 %v816_v0  ;;  %656 = vmatprep.subr.mxu0 %v816_v0  ;;  %v226_v30 = vld [vmem:[#allocation2 + $0xa8] sm:$0xff]  ;;  %v225_v31 = vld [vmem:[#allocation2 + $0xa0] sm:$0xff]  ;;  %v224_v32 = vld [vmem:[#allocation2 + $0x98] sm:$0xff] }
  0x19   :  { %628 = vmatpush3.msra.mxu1 %v137_v8  ;;  %657 = vmatpush3.msra.mxu0 %v235_v21  ;;  %v533_v33 = vld [vmem:[%s1018_s2] ss:$0 sm:$0xff]  ;;  %v223_v38 = vld [vmem:[#allocation2 + $0x90] sm:$0xff]  ;;  %v222_v39 = vld [vmem:[#allocation2 + $0x88] sm:$0xff] }
  0x1a   :  { %629 = vmatprep.subr.mxu1 %v816_v0  ;;  %658 = vmatprep.subr.mxu0 %v816_v0  ;;  %v221_v40 = vld [vmem:[#allocation2 + $0x80] sm:$0xff]  ;;  %v332_v41 = vld [vmem:[#allocation2 + $0x178] sm:$0xff]  ;;  %v331_v42 = vld [vmem:[#allocation2 + $0x170] sm:$0xff] }
  0x1b   :  { %630 = vmatpush3.msra.mxu1 %v136_v9  ;;  %659 = vmatpush3.msra.mxu0 %v234_v22  ;;  %v330_v43 = vld [vmem:[#allocation2 + $0x168] sm:$0xff]  ;;  %v329_v44 = vld [vmem:[#allocation2 + $0x160] sm:$0xff]  ;;  %v328_v45 = vld [vmem:[#allocation2 + $0x158] sm:$0xff] }
  0x1c   :  { %631 = vmatprep.subr.mxu1 %v816_v0  ;;  %660 = vmatprep.subr.mxu0 %v816_v0  ;;  %v327_v46 = vld [vmem:[#allocation2 + $0x150] sm:$0xff]  ;;  %v326_v47 = vld [vmem:[#allocation2 + $0x148] sm:$0xff]  ;;  %v325_v48 = vld [vmem:[#allocation2 + $0x140] sm:$0xff] }
  0x1d   :  { %632 = vmatpush3.msra.mxu1 %v135_v10  ;;  %661 = vmatpush3.msra.mxu0 %v233_v23  ;;  %v324_v49 = vld [vmem:[#allocation2 + $0x138] sm:$0xff]  ;;  %v323_v50 = vld [vmem:[#allocation2 + $0x130] sm:$0xff]  ;;  %v322_v51 = vld [vmem:[#allocation2 + $0x128] sm:$0xff] }
  0x1e   :  { %633 = vmatprep.subr.mxu1 %v816_v0  ;;  %662 = vmatprep.subr.mxu0 %v816_v0  ;;  %v321_v52 = vld [vmem:[#allocation2 + $0x120] sm:$0xff]  ;;  %v320_v53 = vld [vmem:[#allocation2 + $0x118] sm:$0xff]  ;;  %v319_v59 = vld [vmem:[#allocation2 + $0x110] sm:$0xff] }
  0x1f   :  { %634 = vmatpush3.msra.mxu1 %v134_v11  ;;  %663 = vmatpush3.msra.mxu0 %v232_v24  ;;  %v535_v54 = vld [vmem:[%s1020_s4] ss:$0 sm:$0xff]  ;;  %v318_v60 = vld [vmem:[#allocation2 + $0x108] sm:$0xff]  ;;  %v427_v62 = vld [vmem:[%s1021_s5 + $0x78] sm:$0xff] }
  0x20   :  { %635 = vmatprep.subr.mxu1 %v816_v0  ;;  %664 = vmatprep.subr.mxu0 %v816_v0  ;;  %v317_v61 = vld [vmem:[#allocation2 + $0x100] sm:$0xff]  ;;  %v426_v63 = vld [vmem:[%s1021_s5 + $0x70] sm:$0xff]  ;;  %v425_v1 = vld [vmem:[%s1021_s5 + $0x68] sm:$0xff] }
  0x21   :  { %636 = vmatpush3.msra.mxu1 %v133_v12  ;;  %665 = vmatpush3.msra.mxu0 %v231_v25  ;;  %v424_v2 = vld [vmem:[%s1021_s5 + $0x60] sm:$0xff]  ;;  %v423_v3 = vld [vmem:[%s1021_s5 + $0x58] sm:$0xff]  ;;  %v422_v4 = vld [vmem:[%s1021_s5 + $0x50] sm:$0xff] }
  0x22   :  { %637 = vmatprep.subr.mxu1 %v816_v0  ;;  %666 = vmatprep.subr.mxu0 %v816_v0  ;;  %v421_v5 = vld [vmem:[%s1021_s5 + $0x48] sm:$0xff]  ;;  %v420_v6 = vld [vmem:[%s1021_s5 + $0x40] sm:$0xff]  ;;  %v419_v7 = vld [vmem:[%s1021_s5 + $0x38] sm:$0xff] }
  0x23   :  { %638 = vmatpush3.msra.mxu1 %v132_v13  ;;  %667 = vmatpush3.msra.mxu0 %v230_v26  ;;  %v418_v8 = vld [vmem:[%s1021_s5 + $0x30] sm:$0xff]  ;;  %v417_v9 = vld [vmem:[%s1021_s5 + $0x28] sm:$0xff]  ;;  %v416_v10 = vld [vmem:[%s1021_s5 + $0x20] sm:$0xff] }
  0x24   :  { %639 = vmatprep.subr.mxu1 %v816_v0  ;;  %668 = vmatprep.subr.mxu0 %v816_v0  ;;  %v415_v11 = vld [vmem:[%s1021_s5 + $0x18] sm:$0xff]  ;;  %v537_v12 = vld [vmem:[%s1020_s4 + $0x1] ss:$0 sm:$0xff]  ;;  %v539_v20 = vld [vmem:[%s1020_s4 + $0x2] ss:$0 sm:$0xff]  ;;  %s818_s4 = smov [#allocation5]  }
  0x25   :  { %640 = vmatpush3.msra.mxu1 %v131_v14  ;;  %669 = vmatpush3.msra.mxu0 %v229_v27  ;;  %v540_v25 = vld [vmem:[%s1022_s6] ss:$0 sm:$0xff] }
  0x26   :  { %641 = vmatprep.subr.mxu1 %v816_v0  ;;  %670 = vmatprep.subr.mxu0 %v816_v0 }
  0x27   :  { %642 = vmatpush3.msra.mxu1 %v130_v15  ;;  %671 = vmatpush3.msra.mxu0 %v228_v28 }
  0x28   :  { %643 = vmatprep.subr.mxu1 %v816_v0  ;;  %672 = vmatprep.subr.mxu0 %v816_v0 }
  0x29   :  { %644 = vmatpush3.msra.mxu1 %v129_v16  ;;  %673 = vmatpush3.msra.mxu0 %v227_v29 }
  0x2a   :  { %645 = vmatprep.subr.mxu1 %v816_v0  ;;  %674 = vmatprep.subr.mxu0 %v816_v0 }
  0x2b   :  { %646 = vmatpush3.msra.mxu1 %v128_v17  ;;  %675 = vmatpush3.msra.mxu0 %v226_v30  ;;  %v414_v17 = vld [vmem:[%s1021_s5 + $0x10] sm:$0xff] }
  0x2c   :  { %647 = vmatprep.subr.mxu1 %v816_v0  ;;  %676 = vmatprep.subr.mxu0 %v816_v0 }
  0x2d   :  { %648 = vmatpush3.msra.mxu1 %v127_v18  ;;  %677 = vmatpush3.msra.mxu0 %v225_v31  ;;  %v413_v18 = vld [vmem:[%s1021_s5 + $0x8] sm:$0xff] }
  0x2e   :  { %649 = vmatprep.subr.mxu1 %v816_v0  ;;  %678 = vmatprep.subr.mxu0 %v816_v0 }
  0x2f   :  { %650 = vmatpush3.msra.mxu1 %v126_v19  ;;  %679 = vmatpush3.msra.mxu0 %v224_v32  ;;  %v412_v19 = vld [vmem:[%s1021_s5] sm:$0xff]  ;;  %s524_s5 = sshll.u32 %s818_s4, 4  ;;  %s525_s5 = int_to_ptr.vmem [resolvable:$true] %s524_s5 }
  0x30   :  { %689 = vmatprep.subr.mxu1 %v816_v0  ;;  %680 = vmatprep.subr.mxu0 %v816_v0  ;;  %s789_s6 = scalar_lea.vmem %s525_s5, 128  ;;  %p794_p6 = scmp.lt.s32.totalorder %s525_s5, %s525_s5 }
  0x31   :  { %681 = vmatpush3.msra.mxu0 %v223_v38  ;;  %p790_p5 = scmp.ne.s32.totalorder %s525_s5, %s789_s6  ;;  %p795_p7 = scmp.lt.s32.totalorder %s789_s6, %s789_s6 }
  0x32   :  { %682 = vmatprep.subr.mxu0 %v816_v0 }
  0x33   :  { %683 = vmatpush3.msra.mxu0 %v222_v39  ;;  %p796_p8 = por %p795_p7, %p794_p6 }
  0x34   :  { %684 = vmatprep.subr.mxu0 %v816_v0 }
  0x35   :  { %685 = vmatpush3.msra.mxu0 %v221_v40  ;;  %p797_p9 = pnand %p796_p8, %p790_p5 }
  0x36   :  { %724 = vmatprep.subr.mxu0 %v816_v0 }
  0xd4   :  { %v121_v34 = vpop.f32.mrf.mxu0 }
  0xd5   :  { %v122_v35 = vadd.f32 %v533_v33, %v121_v34 }
  0xd6   :  { %v618_v36 = vpop.f32.mrf.mxu0 }
  0xd7   :  { %v125_v37 = vmax.f32 %v122_v35, 0.0 }
  0xd9   :  { %652 = vmatmul.mubr.f32.vlgmr.msra.gmra.mxu1 %v125_v37 }
  0xda   :  { %721 = vmatprep.mubr.msk.f32.mxu1 %vm817_vm0, %v816_v0  ;;  %690 = vmatpush3.msra.mxu1 %v332_v41 }
  0xdb   :  { %691 = vmatprep.subr.mxu1 %v816_v0 }
  0xdc   :  { %692 = vmatpush3.msra.mxu1 %v331_v42 }
  0xdd   :  { %693 = vmatprep.subr.mxu1 %v816_v0 }
  0xde   :  { %694 = vmatpush3.msra.mxu1 %v330_v43 }
  0xdf   :  { %695 = vmatprep.subr.mxu1 %v816_v0 }
  0xe0   :  { %696 = vmatpush3.msra.mxu1 %v329_v44 }
  0xe1   :  { %697 = vmatprep.subr.mxu1 %v816_v0 }
  0xe2   :  { %698 = vmatpush3.msra.mxu1 %v328_v45 }
  0xe3   :  { %699 = vmatprep.subr.mxu1 %v816_v0 }
  0xe4   :  { %700 = vmatpush3.msra.mxu1 %v327_v46 }
  0xe5   :  { %701 = vmatprep.subr.mxu1 %v816_v0 }
  0xe6   :  { %702 = vmatpush3.msra.mxu1 %v326_v47 }
  0xe7   :  { %703 = vmatprep.subr.mxu1 %v816_v0 }
  0xe8   :  { %704 = vmatpush3.msra.mxu1 %v325_v48 }
  0xe9   :  { %705 = vmatprep.subr.mxu1 %v816_v0 }
  0xea   :  { %706 = vmatpush3.msra.mxu1 %v324_v49 }
  0xeb   :  { %707 = vmatprep.subr.mxu1 %v816_v0 }
  0xec   :  { %708 = vmatpush3.msra.mxu1 %v323_v50 }
  0xed   :  { %709 = vmatprep.subr.mxu1 %v816_v0 }
  0xee   :  { %710 = vmatpush3.msra.mxu1 %v322_v51 }
  0xef   :  { %711 = vmatprep.subr.mxu1 %v816_v0 }
  0xf0   :  { %712 = vmatpush3.msra.mxu1 %v321_v52 }
  0xf1   :  { %713 = vmatprep.subr.mxu1 %v816_v0 }
  0xf2   :  { %714 = vmatpush3.msra.mxu1 %v320_v53 }
  0xf3   :  { %715 = vmatprep.subr.mxu1 %v816_v0 }
  0xf4   :  { %716 = vmatpush3.msra.mxu1 %v319_v59 }
  0xf5   :  { %717 = vmatprep.subr.mxu1 %v816_v0 }
  0xf6   :  { %718 = vmatpush3.msra.mxu1 %v318_v60 }
  0xf7   :  { %719 = vmatprep.subr.mxu1 %v816_v0 }
  0xf8   :  { %720 = vmatpush3.msra.mxu1 %v317_v61 }
 0x199   :  { %v215_v55 = vpop.f32.mrf.mxu1 }
 0x19a   :  { %v216_v56 = vadd.f32 %v535_v54, %v215_v55 }
 0x19b   :  { %v653_v57 = vpop.f32.mrf.mxu1 }
 0x19c   :  { %v219_v58 = vmax.f32 %v216_v56, 0.0 }
 0x19e   :  { %687 = vmatmul.mubr.f32.vlgmr.msra.gmra.mxu0 %v219_v58 }
 0x19f   :  { %756 = vmatprep.mubr.msk.f32.mxu0 %vm817_vm0, %v816_v0  ;;  %725 = vmatpush3.msra.mxu0 %v427_v62 }
 0x1a0   :  { %726 = vmatprep.subr.mxu0 %v816_v0 }
 0x1a1   :  { %727 = vmatpush3.msra.mxu0 %v426_v63 }
 0x1a2   :  { %728 = vmatprep.subr.mxu0 %v816_v0 }
 0x1a3   :  { %729 = vmatpush3.msra.mxu0 %v425_v1 }
 0x1a4   :  { %730 = vmatprep.subr.mxu0 %v816_v0 }
 0x1a5   :  { %731 = vmatpush3.msra.mxu0 %v424_v2 }
 0x1a6   :  { %732 = vmatprep.subr.mxu0 %v816_v0 }
 0x1a7   :  { %733 = vmatpush3.msra.mxu0 %v423_v3 }
 0x1a8   :  { %734 = vmatprep.subr.mxu0 %v816_v0 }
 0x1a9   :  { %735 = vmatpush3.msra.mxu0 %v422_v4 }
 0x1aa   :  { %736 = vmatprep.subr.mxu0 %v816_v0 }
 0x1ab   :  { %737 = vmatpush3.msra.mxu0 %v421_v5 }
 0x1ac   :  { %738 = vmatprep.subr.mxu0 %v816_v0 }
 0x1ad   :  { %739 = vmatpush3.msra.mxu0 %v420_v6 }
 0x1ae   :  { %740 = vmatprep.subr.mxu0 %v816_v0 }
 0x1af   :  { %741 = vmatpush3.msra.mxu0 %v419_v7 }
 0x1b0   :  { %742 = vmatprep.subr.mxu0 %v816_v0 }
 0x1b1   :  { %743 = vmatpush3.msra.mxu0 %v418_v8 }
 0x1b2   :  { %744 = vmatprep.subr.mxu0 %v816_v0 }
 0x1b3   :  { %745 = vmatpush3.msra.mxu0 %v417_v9 }
 0x1b4   :  { %746 = vmatprep.subr.mxu0 %v816_v0 }
 0x1b5   :  { %747 = vmatpush3.msra.mxu0 %v416_v10 }
 0x1b6   :  { %748 = vmatprep.subr.mxu0 %v816_v0 }
 0x1b7   :  { %749 = vmatpush3.msra.mxu0 %v415_v11 }
 0x1b8   :  { %750 = vmatprep.subr.mxu0 %v816_v0 }
 0x1b9   :  { %751 = vmatpush3.msra.mxu0 %v414_v17 }
 0x1ba   :  { %752 = vmatprep.subr.mxu0 %v816_v0 }
 0x1bb   :  { %753 = vmatpush3.msra.mxu0 %v413_v18 }
 0x1bc   :  { %754 = vmatprep.subr.mxu0 %v816_v0 }
 0x1bd   :  { %755 = vmatpush3.msra.mxu0 %v412_v19 }
 0x25e   :  { %v311_v13 = vpop.f32.mrf.mxu0 }
 0x25f   :  { %v312_v14 = vadd.f32 %v537_v12, %v311_v13 }
 0x260   :  { %v688_v15 = vpop.f32.mrf.mxu0 }
 0x261   :  { %v315_v16 = vmax.f32 %v312_v14, 0.0 }
 0x263   :  { %722 = vmatmul.mubr.f32.vlgmr.msra.gmra.mxu1 %v315_v16 }
 0x323   :  { %v407_v21 = vpop.f32.mrf.mxu1 }
 0x324   :  { %v408_v22 = vadd.f32 %v539_v20, %v407_v21 }
 0x325   :  { %v723_v23 = vpop.f32.mrf.mxu1 }
 0x326   :  { %v411_v24 = vmax.f32 %v408_v22, 0.0 }
 0x328   :  { %757 = vmatmul.mubr.f32.vlgmr.msra.gmra.mxu0 %v411_v24 }
 0x3e8   :  { %v501_v26 = vpop.f32.mrf.mxu0 }
 0x3e9   :  { %v502_v0 = vadd.f32 %v540_v25, %v501_v26 }
 0x3ea   :  { %v758_v27 = vpop.f32.mrf.mxu0 }
 0x3eb   :  { %v506_v28 = vsel %vm505_vm2, %v502_v0, -inf }
 0x3ec   :  { %507 = vmax.xlane.f32.xlu0 %v506_v28 }
 0x475   :  { %v508_v29 = vpop.xlane.xlu0 %507 }
 0x476   :  { %v509_v30 = vsub.f32 %v502_v0, %v508_v29 }
 0x478   :  { %v510_v31 = vmul.f32 1.442695, %v509_v30 }
 0x47a   :  { %765 = vpow2.f32 %v510_v31 }
 0x487   :  { %v766_v32 = vpop.eup %765 }
 0x488   :  { %v512_v33 = vsel %vm505_vm2, %v766_v32, 0.0 }
 0x489   :  { %513 = vadd.xlane.f32.xlu0 %v512_v33 }
 0x512   :  { %v514_v34 = vpop.xlane.xlu0 %513 }
 0x513   :  { %767 = vrcp.f32 %v514_v34 }
 0x520   :  { %v768_v35 = vpop.eup %767 }
 0x521   :  { %v516_v36 = vmul.f32 %v768_v35, %v766_v32 }
 0x523   :  { %517 = vst.msk [vmem:[#allocation5] sm:$0xff] %vm505_vm2, %v516_v36 }
 0x524   :  { %800 = shalt.err (!%p797_p9)
}
 0x525   :  { %527 = dma.vmem_to_hbm [thread:$0]  %s525_s5, 128, %s1023_s7, [#allocation4]  }
 0x526   :  { %811 = dma.done.wait [#allocation4], 128  }
 0x527   :  { %812 = vsyncadd [#allocation4], 4294967168 }
 0x528   :  { %531 = vsyncpa [#allocation3], 1 }
 0x529   :  { %532 = vsyncpa [#allocation4], 1 }

</bundles_post_ra>
